<compile_context>
chip_gen: v7x
topology: tpu7x:2x2x1
jax: 0.10.0
libtpu: 0.0.40
codegen_flags: <defaults>
</compile_context>

<pallas_src>
import warnings

import jax
import jax.numpy as jnp
from jax import lax
from jax.experimental import pallas as pl
from jax.experimental.pallas import tpu as pltpu


def make_linear_add_relu(bias):
    """Build a fused relu(x @ W + bias + other) Pallas kernel.

    `bias` must be a concrete (OUT,) array at build time; it is baked into the
    kernel as a trace-time constant so it never costs an input DMA.
    """
    bias_vals = tuple(float(v) for v in bias)
    OUT = len(bias_vals)

    def kernel(x_ref, w_ref, other_ref, o_ref):
        # x_ref:     (B, IN)   f32
        # w_ref:     (IN, OUT) f32  (pre-transposed at init; plain x @ W)
        # other_ref: (B, OUT)  f32  (aliased with o_ref)
        # o_ref:     (B, OUT)  f32
        col = lax.broadcasted_iota(jnp.int32, (1, OUT), 1)
        bias_vec = jnp.zeros((1, OUT), jnp.float32)
        for j, bv in enumerate(bias_vals):
            bias_vec = jnp.where(col == j, jnp.float32(bv), bias_vec)

        y = jnp.dot(x_ref[...], w_ref[...], preferred_element_type=jnp.float32)
        y = y + bias_vec + other_ref[...]
        o_ref[...] = jnp.maximum(y, 0.0).astype(o_ref.dtype)

    def fwd(x, w_in_out, other):
        B = x.shape[0]
        vmem = pl.BlockSpec(memory_space=pltpu.MemorySpace.VMEM)
        return pl.pallas_call(
            kernel,
            out_shape=jax.ShapeDtypeStruct((B, OUT), x.dtype),
            in_specs=[vmem, vmem, vmem],
            out_specs=vmem,
            input_output_aliases={2: 0},  # `other` aliases the output buffer
        )(x, w_in_out, other)

    return fwd


if __name__ == "__main__":
    warnings.filterwarnings("ignore", message="Some donated buffers were not usable")

    IN_FEATURES = 32
    OUT_FEATURES = 8
    BATCH = 1  # matches the original spec's x1 = torch.randn(1, 32)

    key = jax.random.PRNGKey(0)
    kx, ko, kw, kb = jax.random.split(key, 4)

    # Deterministic parameter init (mimicking nn.Linear's uniform init range).
    bound = 1.0 / float(jnp.sqrt(jnp.float32(IN_FEATURES)))
    # Weight materialized once at init in (IN, OUT) layout (transpose is free
    # on static weights) -> MXU-friendly, no per-call / in-kernel transpose.
    weight_in_out = jax.random.uniform(
        kw, (IN_FEATURES, OUT_FEATURES), jnp.float32, -bound, bound
    )
    bias = jax.random.uniform(kb, (OUT_FEATURES,), jnp.float32, -bound, bound)

    x1 = jax.random.normal(kx, (BATCH, IN_FEATURES), jnp.float32)
    other = jax.random.normal(ko, (BATCH, OUT_FEATURES), jnp.float32)

    linear_add_relu = make_linear_add_relu(bias)
    fwd = jax.jit(linear_add_relu, donate_argnums=(2,))

    # Reference (computed before the donated call consumes `other`'s buffer).
    ref = jnp.maximum(x1 @ weight_in_out + bias[None, :] + other, 0.0)

    out = jax.block_until_ready(fwd(x1, weight_in_out, other))

    assert out.shape == (BATCH, OUT_FEATURES)
    assert jnp.allclose(out, ref, atol=1e-5, rtol=1e-5)

    print("KERNEL_OK")
</pallas_src>

<mosaic_0001>
module attributes {stable_mosaic.version = 11 : i64} {
  func.func @kernel(%arg0: memref<1x32xf32, #tpu.memory_space<vmem>>, %arg1: memref<32x8xf32, #tpu.memory_space<vmem>>, %arg2: memref<1x8xf32, #tpu.memory_space<vmem>>, %arg3: memref<1x8xf32, #tpu.memory_space<vmem>>) attributes {dimension_semantics = [], scalar_prefetch = 0 : i64, scratch_operands = 0 : i64, tpu.core_type = #tpu.core_type<tc>} {
    %0 = tpu.iota {dimensions = array<i32: 1>} : vector<1x8xi32>
    %cst = arith.constant 0.000000e+00 : f32
    %1 = vector.broadcast %cst : f32 to vector<1x8xf32>
    %c0_i32 = arith.constant 0 : i32
    %2 = vector.broadcast %c0_i32 : i32 to vector<1x8xi32>
    %3 = arith.cmpi eq, %0, %2 : vector<1x8xi32>
    %cst_0 = arith.constant -0.0823816582 : f32
    %4 = vector.broadcast %cst_0 : f32 to vector<1x8xf32>
    %5 = arith.select %3, %4, %1 : vector<1x8xi1>, vector<1x8xf32>
    %c1_i32 = arith.constant 1 : i32
    %6 = vector.broadcast %c1_i32 : i32 to vector<1x8xi32>
    %7 = arith.cmpi eq, %0, %6 : vector<1x8xi32>
    %cst_1 = arith.constant 0.0827138647 : f32
    %8 = vector.broadcast %cst_1 : f32 to vector<1x8xf32>
    %9 = arith.select %7, %8, %5 : vector<1x8xi1>, vector<1x8xf32>
    %c2_i32 = arith.constant 2 : i32
    %10 = vector.broadcast %c2_i32 : i32 to vector<1x8xi32>
    %11 = arith.cmpi eq, %0, %10 : vector<1x8xi32>
    %cst_2 = arith.constant 0.160415322 : f32
    %12 = vector.broadcast %cst_2 : f32 to vector<1x8xf32>
    %13 = arith.select %11, %12, %9 : vector<1x8xi1>, vector<1x8xf32>
    %c3_i32 = arith.constant 3 : i32
    %14 = vector.broadcast %c3_i32 : i32 to vector<1x8xi32>
    %15 = arith.cmpi eq, %0, %14 : vector<1x8xi32>
    %cst_3 = arith.constant -0.102692567 : f32
    %16 = vector.broadcast %cst_3 : f32 to vector<1x8xf32>
    %17 = arith.select %15, %16, %13 : vector<1x8xi1>, vector<1x8xf32>
    %c4_i32 = arith.constant 4 : i32
    %18 = vector.broadcast %c4_i32 : i32 to vector<1x8xi32>
    %19 = arith.cmpi eq, %0, %18 : vector<1x8xi32>
    %cst_4 = arith.constant -0.173599869 : f32
    %20 = vector.broadcast %cst_4 : f32 to vector<1x8xf32>
    %21 = arith.select %19, %20, %17 : vector<1x8xi1>, vector<1x8xf32>
    %c5_i32 = arith.constant 5 : i32
    %22 = vector.broadcast %c5_i32 : i32 to vector<1x8xi32>
    %23 = arith.cmpi eq, %0, %22 : vector<1x8xi32>
    %cst_5 = arith.constant 0.111319564 : f32
    %24 = vector.broadcast %cst_5 : f32 to vector<1x8xf32>
    %25 = arith.select %23, %24, %21 : vector<1x8xi1>, vector<1x8xf32>
    %c6_i32 = arith.constant 6 : i32
    %26 = vector.broadcast %c6_i32 : i32 to vector<1x8xi32>
    %27 = arith.cmpi eq, %0, %26 : vector<1x8xi32>
    %cst_6 = arith.constant 0.151405677 : f32
    %28 = vector.broadcast %cst_6 : f32 to vector<1x8xf32>
    %29 = arith.select %27, %28, %25 : vector<1x8xi1>, vector<1x8xf32>
    %c7_i32 = arith.constant 7 : i32
    %30 = vector.broadcast %c7_i32 : i32 to vector<1x8xi32>
    %31 = arith.cmpi eq, %0, %30 : vector<1x8xi32>
    %cst_7 = arith.constant -0.0792860984 : f32
    %32 = vector.broadcast %cst_7 : f32 to vector<1x8xf32>
    %33 = arith.select %31, %32, %29 : vector<1x8xi1>, vector<1x8xf32>
    %c0 = arith.constant 0 : index
    %c0_8 = arith.constant 0 : index
    %34 = vector.load %arg0[%c0, %c0_8] : memref<1x32xf32, #tpu.memory_space<vmem>>, vector<1x32xf32>
    %c0_9 = arith.constant 0 : index
    %c0_10 = arith.constant 0 : index
    %35 = vector.load %arg1[%c0_9, %c0_10] : memref<32x8xf32, #tpu.memory_space<vmem>>, vector<32x8xf32>
    %cst_11 = arith.constant dense<0.000000e+00> : vector<1x8xf32>
    %36 = tpu.matmul %34, %35, %cst_11 {dimension_numbers = #tpu.dot_dimension_numbers<[1], [0], [0], [1], [0, 0, 1, 1], [], []>} : vector<1x32xf32>, vector<32x8xf32>, vector<1x8xf32> -> vector<1x8xf32>
    %37 = arith.addf %36, %33 : vector<1x8xf32>
    %c0_12 = arith.constant 0 : index
    %c0_13 = arith.constant 0 : index
    %38 = vector.load %arg2[%c0_12, %c0_13] : memref<1x8xf32, #tpu.memory_space<vmem>>, vector<1x8xf32>
    %39 = arith.addf %37, %38 : vector<1x8xf32>
    %cst_14 = arith.constant 0.000000e+00 : f32
    %40 = vector.broadcast %cst_14 : f32 to vector<1x8xf32>
    %41 = arith.maximumf %39, %40 : vector<1x8xf32>
    %c0_15 = arith.constant 0 : index
    %c0_16 = arith.constant 0 : index
    %42 = vector.load %arg3[%c0_15, %c0_16] : memref<1x8xf32, #tpu.memory_space<vmem>>, vector<1x8xf32>
    tpu.vector_store %arg3[%c0_15, %c0_16], %41 {strides = array<i32>} : memref<1x8xf32, #tpu.memory_space<vmem>>, vector<1x8xf32>,
    return
  }
}

</mosaic_0001>

<bundles_post_ra>
// kernel: fwd.1
= control target key start
LH: loop header
LB: loop body
LE: loop exit
PB: predicated region body
PF: predicated region fallthrough
CT: control target
= control target key end

     0   :  { %8 = vsyncpa [#allocation3], 0  ;;  %s284_s0 = inlined_call_operand.vmem [shape: f32[1,32], index: 0, kind: input, shape index: {}]   ;;  %s285_s1 = inlined_call_operand.vmem [shape: f32[32,8], index: 1, kind: input, shape index: {}]   ;;  %s286_s2 = inlined_call_operand.hbm [shape: f32[1,8], index: 2, kind: input, shape index: {}, may-alias: {2,3}]   ;;  %s287_s3 = inlined_call_operand.hbm [shape: f32[1,8], index: 3, kind: output, shape index: {}, may-alias: {2,3}]  }
   0x1   :  { %9 = vsyncpa [#allocation4], 0  ;;  %s220_s12 = smov [#allocation2]   ;;  %s172_s16 = scalar_lea.hbm %s286_s2, 16 }
   0x2   :  { %s20_s13 = sshll.u32 %s220_s12, 4  ;;  %p173_p0 = scmp.ne.s32.totalorder %s286_s2, %s172_s16  ;;  %s21_s13 = int_to_ptr.vmem [resolvable:$true] %s20_s13 }
   0x3   :  { %p176_p1 = scmp.lt.u32.totalorder %s172_s16, %s286_s2 }
   0x5   :  { %p178_p2 = pnand %p176_p1, %p173_p0 }
   0x7   :  { %181 = shalt.err (!%p178_p2)
}
   0x8   :  { %s182_s21 = scalar_lea.vmem %s21_s13, 16  ;;  %s186_s22 = scalar_lea.vmem %s21_s13, 32 }
   0x9   :  { %p183_p3 = scmp.ne.s32.totalorder %s21_s13, %s182_s21  ;;  %p187_p4 = scmp.lt.s32.totalorder %s21_s13, %s21_s13 }
   0xa   :  { %p188_p5 = scmp.lt.s32.totalorder %s186_s22, %s182_s21 }
   0xc   :  { %p189_p6 = por %p188_p5, %p187_p4 }
   0xe   :  { %p190_p7 = pnand %p189_p6, %p183_p3 }
  0x10   :  { %193 = shalt.err (!%p190_p7)
}
  0x11   :  { %23 = dma.hbm_to_vmem [thread:$0]  %s286_s2, 16, %s21_s13, [#allocation3]  }
  0x12   :  { %216 = dma.done.wait [#allocation3], 16  }
  0x13   :  { %217 = vsyncadd [#allocation3], 4294967280  ;;  %v221_v0 = vmov 0.0|0.0   ;;  %vm222_vm0 = vmmov 0   ;;  %v223_v1 = vmov 0.0   ;;  %v46_v2 = vld [vmem:[%s285_s1] sm:$0xff]  ;;  %v27_v9 = vlaneseq }
  0x14   :  { %161 = vmatprep.subr.bf16.mxu0 %v221_v0  ;;  %158 = vmatprep.mubr.msk.f32.mxu0 %vm222_vm0, %v223_v1  ;;  %v47_v3 = vld [vmem:[%s285_s1 + $0x8] sm:$0xff]  ;;  %v48_v4 = vld [vmem:[%s285_s1 + $0x10] sm:$0xff]  ;;  %v49_v6 = vld [vmem:[%s285_s1 + $0x18] sm:$0xff]  ;;  %vm50_vm1 = vcmask 261120   ;;  %vm127_vm10 = vcmask 57344  }
  0x15   :  { %v162_v5 = vpack.c.bf16 %v47_v3, %v46_v2  ;;  %v165_v7 = vpack.c.bf16 %v49_v6, %v48_v4  ;;  %v45_v8 = vld [vmem:[%s284_s0] sm:$0x1]  ;;  %v28_v10 = vand.u32 127, %v27_v9  ;;  %s224_s0 = smov [#allocation5]  }
  0x16   :  { %v124_v20 = vld [vmem:[#allocation2] sm:$0x1]  ;;  %s135_s1 = sshll.u32 %s224_s0, 4  ;;  %s136_s1 = int_to_ptr.vmem [resolvable:$true] %s135_s1 }
  0x17   :  { %163 = vmatpush3.bf16.msra.mxu0 %v162_v5  ;;  %vm29_vm2 = vcmp.eq.s32.totalorder %v28_v10, 0  ;;  %vm31_vm3 = vcmp.eq.s32.totalorder %v28_v10, 1  ;;  %vm33_vm4 = vcmp.eq.s32.totalorder %v28_v10, 2  ;;  %vm35_vm5 = vcmp.eq.s32.totalorder %v28_v10, 3  ;;  %s194_s7 = scalar_lea.vmem %s136_s1, 16  ;;  %s198_s8 = scalar_lea.vmem %s136_s1, 32 }
  0x18   :  { %164 = vmatprep.subr.bf16.mxu0 %v221_v0  ;;  %v30_v11 = vsel %vm29_vm2, -0.08238166, %v223_v1  ;;  %vm37_vm6 = vcmp.eq.s32.totalorder %v28_v10, 4  ;;  %vm39_vm7 = vcmp.eq.s32.totalorder %v28_v10, 5  ;;  %vm41_vm8 = vcmp.eq.s32.totalorder %v28_v10, 6  ;;  %p195_p8 = scmp.ne.s32.totalorder %s136_s1, %s194_s7  ;;  %p199_p9 = scmp.lt.s32.totalorder %s136_s1, %s136_s1 }
  0x19   :  { %v32_v12 = vsel %vm31_vm3, 0.082713865, %v30_v11  ;;  %vm43_vm9 = vcmp.eq.s32.totalorder %v28_v10, 7  ;;  %p200_p10 = scmp.lt.s32.totalorder %s198_s8, %s194_s7 }
  0x1a   :  { %v34_v13 = vsel %vm33_vm4, 0.16041532, %v32_v12 }
  0x1b   :  { %166 = vmatpush3.bf16.msra.mxu0 %v165_v7  ;;  %v36_v14 = vsel %vm35_vm5, -0.10269257, %v34_v13  ;;  %p201_p11 = por %p200_p10, %p199_p9 }
  0x1c   :  { %v38_v15 = vsel %vm37_vm6, -0.17359987, %v36_v14 }
  0x1d   :  { %v40_v16 = vsel %vm39_vm7, 0.111319564, %v38_v15  ;;  %p202_p12 = pnand %p201_p11, %p195_p8 }
  0x1e   :  { %159 = vmatmul.mubr.msk.f32.vlgmr.msra.gmra.mrb[0].mxu0 %vm50_vm1, %v45_v8  ;;  %v42_v17 = vsel %vm41_vm8, 0.15140568, %v40_v16 }
  0x1f   :  { %v44_v18 = vsel %vm43_vm9, -0.0792861, %v42_v17 }
  0xf1   :  { %v120_v19 = vpop.f32.mrb[0].mxu0 }
  0xf2   :  { %v121_v21 = vadd.f32 %v120_v19, %v44_v18  ;;  %v160_v22 = vpop.f32.mrb[1].mxu0 }
  0xf4   :  { %v125_v23 = vadd.f32 %v124_v20, %v121_v21 }
  0xf6   :  { %v126_v24 = vmax.f32 %v125_v23, 0.0 }
  0xf8   :  { %128 = vst.msk [vmem:[#allocation5] sm:$0x1] %vm127_vm10, %v126_v24 }
  0xf9   :  { %205 = shalt.err (!%p202_p12)
}
  0xfa   :  { %s206_s11 = scalar_lea.hbm %s287_s3, 16 }
  0xfb   :  { %p207_p13 = scmp.ne.s32.totalorder %s287_s3, %s206_s11  ;;  %p210_p0 = scmp.lt.u32.totalorder %s206_s11, %s287_s3 }
  0xfd   :  { %p212_p1 = pnand %p210_p0, %p207_p13 }
  0xff   :  { %215 = shalt.err (!%p212_p1)
}
 0x100   :  { %138 = dma.vmem_to_hbm [thread:$0]  %s136_s1, 16, %s287_s3, [#allocation4]  }
 0x101   :  { %218 = dma.done.wait [#allocation4], 16  }
 0x102   :  { %219 = vsyncadd [#allocation4], 4294967280 }
 0x103   :  { %142 = vsyncpa [#allocation3], 1 }
 0x104   :  { %143 = vsyncpa [#allocation4], 1 }

</bundles_post_ra>
